<compile_context>
chip_gen: v6e
topology: v6e:2x2x1
jax: 0.10.0
libtpu: 0.0.40
codegen_flags: <defaults>
</compile_context>

<pallas_src>
import functools
import math

import jax
import jax.numpy as jnp
from jax.experimental import pallas as pl
from jax.experimental.pallas import tpu as pltpu


def calculate_k(C, gamma=2, b=1):
    log_term = math.log2(C) / gamma
    k = abs(int((log_term + b / gamma) // 2) * 2 + 1)
    return k


def _round_up(v, m):
    return ((v + m - 1) // m) * m


def _pick_hw_tile(hw_p, c_p, max_block_bytes=2 * 1024 * 1024):
    """Largest lane-dense HW tile (multiple of 128) that divides hw_p and
    keeps a (c_p, tile) f32 block within the per-block VMEM budget."""
    for t in (2048, 1024, 512, 256, 128):
        if hw_p % t == 0 and c_p * t * 4 <= max_block_bytes:
            return t
    return 128


# ---------- Pass 1: pooling reduction + tiny conv/bias/sigmoid epilogue -----

def _reduce_kernel(x_ref, w_ref, b_ref, coef_ref, a_ref, sum_acc, max_acc,
                   *, hw, tile_hw, hw_padded, c, c_padded):
    # x_ref:    (C_p, tile_hw) f32 VMEM   streamed HW tile of x
    # w_ref:    (C_p, C_p)     f32 VMEM   center tap of the Conv1d weight
    # b_ref:    (C_p, 1)       f32 VMEM   Conv1d bias
    # coef_ref: (2,)           f32 SMEM   [0.5+alpha, 0.5+beta]
    # a_ref:    (C_p, 1)       f32 VMEM   output gate A_C (written last step)
    # sum_acc/max_acc: (C_p, 128) f32 VMEM scratch accumulators
    i = pl.program_id(0)

    @pl.when(i == 0)
    def _init():
        sum_acc[...] = jnp.zeros_like(sum_acc)
        max_acc[...] = jnp.full_like(max_acc, -jnp.inf)

    x = x_ref[...]                                    # (C_p, tile_hw)

    if hw_padded:
        # Only the tail of the last tile can be padding; mask it out.
        base = i * tile_hw
        lane = jax.lax.broadcasted_iota(jnp.int32, x.shape, 1)
        valid = (lane + base) < hw
        x_sum = jnp.where(valid, x, 0.0)
        x_max = jnp.where(valid, x, -jnp.inf)
    else:
        x_sum = x
        x_max = x

    ps = sum_acc[...]
    pm = max_acc[...]
    for j in range(tile_hw // 128):                   # static unroll, pure VPU
        sl = slice(j * 128, (j + 1) * 128)
        ps = ps + x_sum[:, sl]
        pm = jnp.maximum(pm, x_max[:, sl])
    sum_acc[...] = ps
    max_acc[...] = pm

    @pl.when(i == pl.num_programs(0) - 1)
    def _epilogue():
        # Single cross-lane (XLU) reduce, done once.
        f_avg = jnp.sum(sum_acc[...], axis=1, keepdims=True) * (1.0 / hw)
        f_max = jnp.max(max_acc[...], axis=1, keepdims=True)
        c0 = coef_ref[0]                              # 0.5 + alpha
        c1 = coef_ref[1]                              # 0.5 + beta
        f_add = c0 * f_avg + c1 * f_max               # (C_p, 1)
        if c_padded:
            row = jax.lax.broadcasted_iota(jnp.int32, f_add.shape, 0)
            f_add = jnp.where(row < c, f_add, 0.0)
        # Center-tap Conv1d == (C,C)@(C,1) matmul + bias; tiny, epilogue only.
        logits = jnp.dot(w_ref[...], f_add,
                         preferred_element_type=jnp.float32) + b_ref[...]
        a_ref[...] = jax.nn.sigmoid(logits)           # (C_p, 1)


# ---------- Pass 2: lane-dense elementwise scale ----------------------------

def _scale_kernel(x_ref, a_ref, o_ref):
    # x_ref: (C_p, tile_hw), a_ref: (C_p, 1) broadcast over lanes.
    o_ref[...] = x_ref[...] * a_ref[...]


# ---------- Wrapper ----------------------------------------------------------

def channel_attention(x, conv_w, conv_b, alpha, beta):
    """x: (1, C, H, W) NCHW float32; conv_w: (C, C, k); conv_b: (C,)."""
    B, C, H, W = x.shape
    assert B == 1, "torch module's view(1,-1,1,1) broadcast requires batch==1"
    k = conv_w.shape[-1]
    HW = H * W

    C_p = max(8, _round_up(C, 8))
    HW_p = max(128, _round_up(HW, 128))

    x2d = x.reshape(C, HW).astype(jnp.float32)
    if (C_p, HW_p) != (C, HW):
        x2d = jnp.zeros((C_p, HW_p), jnp.float32).at[:C, :HW].set(x2d)

    w_center = conv_w[:, :, k // 2].astype(jnp.float32)        # (C, C)
    w_p = jnp.zeros((C_p, C_p), jnp.float32).at[:C, :C].set(w_center)
    b_p = jnp.zeros((C_p, 1), jnp.float32).at[:C, 0].set(conv_b.astype(jnp.float32))
    # Fold scalar algebra: 0.5*(avg+max) + alpha*avg + beta*max
    #                    = (0.5+alpha)*avg + (0.5+beta)*max
    coeffs = jnp.stack([0.5 + alpha, 0.5 + beta]).astype(jnp.float32)

    t_red = _pick_hw_tile(HW_p, C_p)
    t_scl = _pick_hw_tile(HW_p, C_p)
    vmem_limit = 32 * 1024 * 1024   # explicit, valid on v5e/v6e/v7x

    # Pass 1: pipelined pooling reduction over HW tiles + epilogue gate.
    a_c = pl.pallas_call(
        functools.partial(_reduce_kernel, hw=HW, tile_hw=t_red,
                          hw_padded=(HW_p != HW), c=C, c_padded=(C_p != C)),
        out_shape=jax.ShapeDtypeStruct((C_p, 1), jnp.float32),
        grid=(HW_p // t_red,),
        in_specs=[
            pl.BlockSpec((C_p, t_red), lambda i: (0, i)),
            pl.BlockSpec((C_p, C_p), lambda i: (0, 0)),
            pl.BlockSpec((C_p, 1), lambda i: (0, 0)),
            pl.BlockSpec(memory_space=pltpu.MemorySpace.SMEM),
        ],
        out_specs=pl.BlockSpec((C_p, 1), lambda i: (0, 0)),
        scratch_shapes=[pltpu.VMEM((C_p, 128), jnp.float32),
                        pltpu.VMEM((C_p, 128), jnp.float32)],
        compiler_params=pltpu.CompilerParams(
            dimension_semantics=("arbitrary",),
            vmem_limit_bytes=vmem_limit),
    )(x2d, w_p, b_p, coeffs)

    # Pass 2: pipelined, lane-dense elementwise scale x * A_C.
    out2d = pl.pallas_call(
        _scale_kernel,
        out_shape=jax.ShapeDtypeStruct((C_p, HW_p), jnp.float32),
        grid=(HW_p // t_scl,),
        in_specs=[
            pl.BlockSpec((C_p, t_scl), lambda i: (0, i)),
            pl.BlockSpec((C_p, 1), lambda i: (0, 0)),
        ],
        out_specs=pl.BlockSpec((C_p, t_scl), lambda i: (0, i)),
        compiler_params=pltpu.CompilerParams(
            dimension_semantics=("parallel",),
            vmem_limit_bytes=vmem_limit),
    )(x2d, a_c)

    return out2d[:C, :HW].reshape(B, C, H, W)


def reference(x, conv_w, conv_b, alpha, beta):
    """Pure-JAX reference mirroring the torch forward exactly."""
    B, C, H, W = x.shape
    k = conv_w.shape[-1]
    f_avg = jnp.mean(x, axis=(2, 3), keepdims=True)            # (B, C, 1, 1)
    f_max = jnp.max(x, axis=(2, 3), keepdims=True)             # (B, C, 1, 1)
    f_add = 0.5 * (f_avg + f_max) + alpha * f_avg + beta * f_max
    f = jnp.squeeze(f_add, axis=-1)                            # (B, C, 1)
    a = jax.lax.conv_general_dilated(
        f, conv_w, window_strides=(1,), padding=[(k // 2, k // 2)],
        dimension_numbers=("NCH", "OIH", "NCH"),
    ) + conv_b.reshape(1, C, 1)
    a = jax.nn.sigmoid(a).reshape(1, -1, 1, 1)                 # (1, B*C, 1, 1)
    return x * a


if __name__ == "__main__":
    B, C, H, W = 1, 16, 16, 16      # batch must be 1 (see layout comment)
    k = calculate_k(C)              # k = 3 for C = 16

    key = jax.random.PRNGKey(0)
    kx, kw, kb, ka, kbeta = jax.random.split(key, 5)

    x = jax.random.normal(kx, (B, C, H, W), dtype=jnp.float32)
    # Deterministic synthetic params (Conv1d: weight (C, C, k), bias (C,)).
    fan_in = C * k
    bound = 1.0 / math.sqrt(fan_in)
    conv_w = jax.random.uniform(kw, (C, C, k), jnp.float32, -bound, bound)
    conv_b = jax.random.uniform(kb, (C,), jnp.float32, -bound, bound)
    alpha = jax.random.uniform(ka, (), jnp.float32)            # torch.rand(1)
    beta = jax.random.uniform(kbeta, (), jnp.float32)          # torch.rand(1)

    out = channel_attention(x, conv_w, conv_b, alpha, beta)
    out = jax.block_until_ready(out)

    ref = reference(x, conv_w, conv_b, alpha, beta)
    assert out.shape == ref.shape == (B, C, H, W)
    assert jnp.allclose(out, ref, atol=1e-5, rtol=1e-5), "mismatch vs reference"

    # TODO(synk): optional bf16 streaming of x/out would halve HBM bytes on the
    # memory-bound passes; kept f32 here for exact parity with the reference.
    print("KERNEL_OK")
</pallas_src>

<mosaic_0001>
module attributes {stable_mosaic.version = 11 : i64} {
  func.func @_reduce_kernel(%arg0: i32, %arg1: memref<16x256xf32, #tpu.memory_space<vmem>>, %arg2: memref<16x16xf32, #tpu.memory_space<vmem>>, %arg3: memref<16x1xf32, #tpu.memory_space<vmem>>, %arg4: memref<2xf32, #tpu.memory_space<smem>>, %arg5: memref<16x1xf32, #tpu.memory_space<vmem>>, %arg6: memref<16x128xf32, #tpu.memory_space<vmem>>, %arg7: memref<16x128xf32, #tpu.memory_space<vmem>>) attributes {dimension_semantics = [#tpu.dimension_semantics<arbitrary>], iteration_bounds = array<i64: 1>, scalar_prefetch = 0 : i64, scratch_operands = 2 : i64, tpu.core_type = #tpu.core_type<tc>, window_params = [{transform_indices = @transform_0, window_bounds = array<i64: 16, 256>}, {pipeline_mode = #tpu.pipeline_mode<synchronous>, transform_indices = @transform_1, window_bounds = array<i64: 16, 16>}, {pipeline_mode = #tpu.pipeline_mode<synchronous>, transform_indices = @transform_2, window_bounds = array<i64: 16, 1>}, {transform_indices = @transform_3, window_bounds = array<i64: 2>}, {pipeline_mode = #tpu.pipeline_mode<synchronous>, transform_indices = @transform_4, window_bounds = array<i64: 16, 1>}]} {
    %c0_i32 = arith.constant 0 : i32
    %0 = arith.cmpi eq, %arg0, %c0_i32 : i32
    %1 = arith.extui %0 : i1 to i32
    %c0_i32_0 = arith.constant 0 : i32
    %2 = arith.cmpi ne, %1, %c0_i32_0 : i32
    scf.if %2 {
      %cst = arith.constant 0.000000e+00 : f32
      %19 = vector.broadcast %cst : f32 to vector<16x128xf32>
      %c0_12 = arith.constant 0 : index
      %c0_13 = arith.constant 0 : index
      %20 = vector.load %arg6[%c0_12, %c0_13] : memref<16x128xf32, #tpu.memory_space<vmem>>, vector<16x128xf32>
      tpu.vector_store %arg6[%c0_12, %c0_13], %19 {strides = array<i32>} : memref<16x128xf32, #tpu.memory_space<vmem>>, vector<16x128xf32>,
      %cst_14 = arith.constant 0xFF800000 : f32
      %21 = vector.broadcast %cst_14 : f32 to vector<16x128xf32>
      %c0_15 = arith.constant 0 : index
      %c0_16 = arith.constant 0 : index
      %22 = vector.load %arg7[%c0_15, %c0_16] : memref<16x128xf32, #tpu.memory_space<vmem>>, vector<16x128xf32>
      tpu.vector_store %arg7[%c0_15, %c0_16], %21 {strides = array<i32>} : memref<16x128xf32, #tpu.memory_space<vmem>>, vector<16x128xf32>,
    } else {
    }
    %c0 = arith.constant 0 : index
    %c0_1 = arith.constant 0 : index
    %3 = vector.load %arg1[%c0, %c0_1] : memref<16x256xf32, #tpu.memory_space<vmem>>, vector<16x256xf32>
    %c0_2 = arith.constant 0 : index
    %c0_3 = arith.constant 0 : index
    %4 = vector.load %arg6[%c0_2, %c0_3] : memref<16x128xf32, #tpu.memory_space<vmem>>, vector<16x128xf32>
    %c0_4 = arith.constant 0 : index
    %c0_5 = arith.constant 0 : index
    %5 = vector.load %arg7[%c0_4, %c0_5] : memref<16x128xf32, #tpu.memory_space<vmem>>, vector<16x128xf32>
    %6 = vector.extract_strided_slice %3 {offsets = [0, 0], sizes = [16, 128], strides = [1, 1]} : vector<16x256xf32> to vector<16x128xf32>
    %7 = arith.addf %4, %6 : vector<16x128xf32>
    %8 = vector.extract_strided_slice %3 {offsets = [0, 0], sizes = [16, 128], strides = [1, 1]} : vector<16x256xf32> to vector<16x128xf32>
    %9 = arith.maximumf %5, %8 : vector<16x128xf32>
    %10 = vector.extract_strided_slice %3 {offsets = [0, 128], sizes = [16, 128], strides = [1, 1]} : vector<16x256xf32> to vector<16x128xf32>
    %11 = arith.addf %7, %10 : vector<16x128xf32>
    %12 = vector.extract_strided_slice %3 {offsets = [0, 128], sizes = [16, 128], strides = [1, 1]} : vector<16x256xf32> to vector<16x128xf32>
    %13 = arith.maximumf %9, %12 : vector<16x128xf32>
    %c0_6 = arith.constant 0 : index
    %c0_7 = arith.constant 0 : index
    %14 = vector.load %arg6[%c0_6, %c0_7] : memref<16x128xf32, #tpu.memory_space<vmem>>, vector<16x128xf32>
    tpu.vector_store %arg6[%c0_6, %c0_7], %11 {strides = array<i32>} : memref<16x128xf32, #tpu.memory_space<vmem>>, vector<16x128xf32>,
    %c0_8 = arith.constant 0 : index
    %c0_9 = arith.constant 0 : index
    %15 = vector.load %arg7[%c0_8, %c0_9] : memref<16x128xf32, #tpu.memory_space<vmem>>, vector<16x128xf32>
    tpu.vector_store %arg7[%c0_8, %c0_9], %13 {strides = array<i32>} : memref<16x128xf32, #tpu.memory_space<vmem>>, vector<16x128xf32>,
    %c0_i32_10 = arith.constant 0 : i32
    %16 = arith.cmpi eq, %arg0, %c0_i32_10 : i32
    %17 = arith.extui %16 : i1 to i32
    %c0_i32_11 = arith.constant 0 : i32
    %18 = arith.cmpi ne, %17, %c0_i32_11 : i32
    scf.if %18 {
      %c0_12 = arith.constant 0 : index
      %c0_13 = arith.constant 0 : index
      %19 = vector.load %arg6[%c0_12, %c0_13] : memref<16x128xf32, #tpu.memory_space<vmem>>, vector<16x128xf32>
      %cst = arith.constant dense<0.000000e+00> : vector<16xf32>
      %20 = vector.multi_reduction <add>, %19, %cst [1] : vector<16x128xf32> to vector<16xf32>
      %21 = vector.shape_cast %20 : vector<16xf32> to vector<16x1xf32>
      %cst_14 = arith.constant 3.906250e-03 : f32
      %22 = vector.broadcast %cst_14 : f32 to vector<16x1xf32>
      %23 = arith.mulf %21, %22 : vector<16x1xf32>
      %c0_15 = arith.constant 0 : index
      %c0_16 = arith.constant 0 : index
      %24 = vector.load %arg7[%c0_15, %c0_16] : memref<16x128xf32, #tpu.memory_space<vmem>>, vector<16x128xf32>
      %cst_17 = arith.constant dense<0xFF800000> : vector<16xf32>
      %25 = vector.multi_reduction <maximumf>, %24, %cst_17 [1] : vector<16x128xf32> to vector<16xf32>
      %26 = vector.shape_cast %25 : vector<16xf32> to vector<16x1xf32>
      %c0_18 = arith.constant 0 : index
      %27 = memref.load %arg4[%c0_18] : memref<2xf32, #tpu.memory_space<smem>>
      %c1 = arith.constant 1 : index
      %28 = memref.load %arg4[%c1] : memref<2xf32, #tpu.memory_space<smem>>
      %29 = vector.broadcast %27 : f32 to vector<16x1xf32>
      %30 = arith.mulf %29, %23 : vector<16x1xf32>
      %31 = vector.broadcast %28 : f32 to vector<16x1xf32>
      %32 = arith.mulf %31, %26 : vector<16x1xf32>
      %33 = arith.addf %30, %32 : vector<16x1xf32>
      %c0_19 = arith.constant 0 : index
      %c0_20 = arith.constant 0 : index
      %34 = vector.load %arg2[%c0_19, %c0_20] : memref<16x16xf32, #tpu.memory_space<vmem>>, vector<16x16xf32>
      %cst_21 = arith.constant dense<0.000000e+00> : vector<16x1xf32>
      %35 = tpu.matmul %34, %33, %cst_21 {dimension_numbers = #tpu.dot_dimension_numbers<[1], [0], [0], [1], [0, 0, 1, 1], [], []>} : vector<16x16xf32>, vector<16x1xf32>, vector<16x1xf32> -> vector<16x1xf32>
      %c0_22 = arith.constant 0 : index
      %c0_23 = arith.constant 0 : index
      %36 = vector.load %arg3[%c0_22, %c0_23] : memref<16x1xf32, #tpu.memory_space<vmem>>, vector<16x1xf32>
      %37 = arith.addf %35, %36 : vector<16x1xf32>
      %38 = arith.negf %37 : vector<16x1xf32>
      %39 = math.exp %38 : vector<16x1xf32>
      %cst_24 = arith.constant 1.000000e+00 : f32
      %40 = vector.broadcast %cst_24 : f32 to vector<16x1xf32>
      %41 = arith.addf %40, %39 : vector<16x1xf32>
      %42 = arith.divf %40, %41 : vector<16x1xf32>
      %c0_25 = arith.constant 0 : index
      %c0_26 = arith.constant 0 : index
      %43 = vector.load %arg5[%c0_25, %c0_26] : memref<16x1xf32, #tpu.memory_space<vmem>>, vector<16x1xf32>
      tpu.vector_store %arg5[%c0_25, %c0_26], %42 {strides = array<i32>} : memref<16x1xf32, #tpu.memory_space<vmem>>, vector<16x1xf32>,
    } else {
    }
    return
  }
  func.func @transform_0(%arg0: i32) -> (i32, i32) {
    %c0_i32 = arith.constant 0 : i32
    %c0_i32_0 = arith.constant 0 : i32
    return %c0_i32, %arg0 : i32, i32
  }
  func.func @transform_1(%arg0: i32) -> (i32, i32) {
    %c0_i32 = arith.constant 0 : i32
    %c0_i32_0 = arith.constant 0 : i32
    %c0_i32_1 = arith.constant 0 : i32
    return %c0_i32, %c0_i32_0 : i32, i32
  }
  func.func @transform_2(%arg0: i32) -> (i32, i32) {
    %c0_i32 = arith.constant 0 : i32
    %c0_i32_0 = arith.constant 0 : i32
    %c0_i32_1 = arith.constant 0 : i32
    return %c0_i32, %c0_i32_0 : i32, i32
  }
  func.func @transform_3(%arg0: i32) -> i32 {
    %c0_i32 = arith.constant 0 : i32
    %c0_i32_0 = arith.constant 0 : i32
    return %c0_i32 : i32
  }
  func.func @transform_4(%arg0: i32) -> (i32, i32) {
    %c0_i32 = arith.constant 0 : i32
    %c0_i32_0 = arith.constant 0 : i32
    %c0_i32_1 = arith.constant 0 : i32
    return %c0_i32, %c0_i32_0 : i32, i32
  }
}

</mosaic_0001>

<bundles_post_ra>
// kernel: tpu_custom_call.1
= control target key start
LH: loop header
LB: loop body
LE: loop exit
PB: predicated region body
PF: predicated region fallthrough
CT: control target
= control target key end

     0   :  { %9 = vsyncpa [#allocation5], 0  ;;  %s325_s0 = inlined_call_operand.hbm [shape: f32[16,256], index: 0, kind: input, shape index: {}]   ;;  %s326_s1 = inlined_call_operand.vmem [shape: f32[16,16], index: 1, kind: input, shape index: {}]   ;;  %s327_s2 = inlined_call_operand.vmem [shape: f32[16,1], index: 2, kind: input, shape index: {}]   ;;  %s328_s3 = inlined_call_operand.vmem [shape: f32[2], index: 3, kind: input, shape index: {}]   ;;  %s329_s4 = inlined_call_operand.vmem [shape: f32[16,1], index: 4, kind: output, shape index: {}]  }
   0x1   :  { %10 = vsyncpa [#allocation6], 0  ;;  %s270_s15 = smov [#allocation4]   ;;  %s33_s19 = sshll.u32 %s328_s3, 4  ;;  %s34_s19 = int_to_ptr.vmem [resolvable:$true] %s33_s19 }
   0x2   :  { %s16_s16 = sshll.u32 %s270_s15, 4  ;;  %s17_s16 = int_to_ptr.vmem [resolvable:$true] %s16_s16 }
   0x3   :  { %s242_s20 = scalar_lea.vmem %s17_s16, 512  ;;  %p247_p1 = scmp.lt.s32.totalorder %s17_s16, %s17_s16 }
   0x4   :  { %p243_p0 = scmp.ne.s32.totalorder %s17_s16, %s242_s20  ;;  %p248_p2 = scmp.lt.s32.totalorder %s242_s20, %s242_s20 }
   0x6   :  { %p249_p3 = por %p248_p2, %p247_p1 }
   0x8   :  { %p250_p4 = pnand %p249_p3, %p243_p0 }
   0xa   :  { %253 = shalt.err (!%p250_p4)
}
   0xb   :  { %s271_s21 = smov 256   ;;  %s272_s22 = smov 16  }
   0xc   :  { %22 = dma.hbm_to_vmem [thread:$0]  %s325_s0, 512, %s17_s16, [#allocation5], %s271_s21, %s271_s21, %s272_s22  }
   0xd   :  { %s254_s25 = scalar_lea.vmem %s34_s19, 16  ;;  %p259_p6 = scmp.lt.s32.totalorder %s34_s19, %s34_s19 }
   0xe   :  { %p255_p5 = scmp.ne.s32.totalorder %s34_s19, %s254_s25  ;;  %p260_p7 = scmp.lt.s32.totalorder %s254_s25, %s254_s25 }
  0x10   :  { %p261_p8 = por %p260_p7, %p259_p6 }
  0x12   :  { %p262_p9 = pnand %p261_p8, %p255_p5 }
  0x14   :  { %265 = shalt.err (!%p262_p9)
}
  0x15   :  { %s273_s3 = smov [#allocation7]  }
  0x16   :  { %36 = dma.vmem_to_smem %s34_s19, 16, %s273_s3, [#allocation6]  }
  0x17   :  { %266 = dma.done.wait [#allocation5], 512  }
  0x18   :  { %267 = vsyncadd [#allocation5], 4294966784 }
  0x19   :  { %268 = dma.done.wait [#allocation6], 16  }
  0x1a   :  { %269 = vsyncadd [#allocation6], 4294967280 }
  0x1b   :  { %43 = sfence }
  0x1c   :  { %v54_v0 = vld [vmem:[#allocation4 + $0x10] sm:$0xff]  ;;  %v55_v1 = vld [vmem:[#allocation4 + $0x18] sm:$0xff]  ;;  %v52_v2 = vld [vmem:[#allocation4] sm:$0xff]  ;;  %vm103_vm0 = vcmask 130048   ;;  %s206_s27 = sld [smem:[#allocation7 + $0x1]]  ;;  %vm197_vm1 = vcmask 7168  }
  0x1d   :  { %v65_v3 = vadd.f32 %v55_v1, %v54_v0  ;;  %v67_v4 = vmax.f32 %v54_v0, %v55_v1  ;;  %v53_v5 = vld [vmem:[#allocation4 + $0x8] sm:$0xff]  ;;  %v99_v8 = vld [vmem:[%s326_s1] sm:$0xff]  ;;  %s89_s28 = sld [smem:[#allocation7]] }
  0x1e   :  { %v64_v6 = vadd.f32 %v53_v5, %v52_v2  ;;  %v66_v7 = vmax.f32 %v52_v2, %v53_v5  ;;  %219 = vmatprep.mubr.msk.f32.mxu0 %vm103_vm0, %v99_v8  ;;  %v100_v23 = vld [vmem:[%s326_s1 + $0x8] sm:$0xff]  ;;  %v101_v26 = vld [vmem:[%s327_s2] sm:$0xff] }
  0x1f   :  { %79 = vadd.xlane.f32.xlu0 %v65_v3  ;;  %87 = vmax.xlane.f32.xlu1 %v67_v4  ;;  %v102_v24 = vld [vmem:[%s327_s2 + $0x8] sm:$0xff] }
  0x22   :  { %v94_v9 = vstv %s206_s27 }
  0x23   :  { %77 = vadd.xlane.f32.xlu0 %v64_v6  ;;  %85 = vmax.xlane.f32.xlu1 %v66_v7  ;;  %v91_v10 = vstv %s89_s28 }
  0xa8   :  { %v80_v11 = vpop.xlane.xlu0 %79  ;;  %v88_v12 = vpop.xlane.xlu1 %87 }
  0xa9   :  { %v82_v13 = vmul.f32 0.00390625, %v80_v11  ;;  %v96_v14 = vmul.f32 %v94_v9, %v88_v12 }
  0xab   :  { %v93_v15 = vmul.f32 %v91_v10, %v82_v13 }
  0xac   :  { %v78_v16 = vpop.xlane.xlu0 %77  ;;  %v86_v17 = vpop.xlane.xlu1 %85 }
  0xad   :  { %v81_v18 = vmul.f32 0.00390625, %v78_v16  ;;  %v95_v19 = vmul.f32 %v94_v9, %v86_v17  ;;  %v98_v20 = vadd.f32 %v96_v14, %v93_v15 }
  0xaf   :  { %v92_v21 = vmul.f32 %v91_v10, %v81_v18  ;;  %215 = vmatprep.subr.mxu0 %v98_v20 }
  0xb0   :  { %216 = vmatpush3.msra.mxu0 %v98_v20 }
  0xb1   :  { %v97_v22 = vadd.f32 %v95_v19, %v92_v21 }
  0xb3   :  { %217 = vmatprep.subr.mxu0 %v97_v22 }
  0xb4   :  { %218 = vmatpush3.msra.mxu0 %v97_v22 }
  0xb5   :  { %220 = vmatmul.mubr.msk.f32.vlgmr.msra.gmra.mxu0 %vm103_vm0, %v100_v23 }
 0x175   :  { %v221_v25 = vpop.f32.mrf.mxu0 }
 0x176   :  { %v182_v27 = vadd.f32 %v221_v25, %v102_v24 }
 0x177   :  { %v176_v28 = vpop.f32.mrf.mxu0 }
 0x178   :  { %v210_v29 = vmul.f32 -1.442695, %v182_v27  ;;  %v177_v30 = vadd.f32 %v176_v28, %v101_v26 }
 0x17a   :  { %226 = vpow2.f32 %v210_v29  ;;  %v209_v31 = vmul.f32 -1.442695, %v177_v30 }
 0x17c   :  { %228 = vpow2.f32 %v209_v31 }
 0x187   :  { %v227_v32 = vpop.eup %226 }
 0x188   :  { %v192_v33 = vadd.f32 1.0, %v227_v32 }
 0x189   :  { %v229_v34 = vpop.eup %228 }
 0x18a   :  { %230 = vrcp.f32 %v192_v33  ;;  %v191_v35 = vadd.f32 1.0, %v229_v34 }
 0x18c   :  { %232 = vrcp.f32 %v191_v35 }
 0x197   :  { %v231_v36 = vpop.eup %230 }
 0x198   :  { %199 = vst.msk [vmem:[%s329_s4 + $0x8] sm:$0xff] %vm197_vm1, %v231_v36 }
 0x199   :  { %v233_v37 = vpop.eup %232 }
 0x19a   :  { %198 = vst.msk [vmem:[%s329_s4] sm:$0xff] %vm197_vm1, %v233_v37 }
 0x19b   :  { %204 = vsyncpa [#allocation5], 1 }
 0x19c   :  { %205 = vsyncpa [#allocation6], 1 }

</bundles_post_ra>
